<compile_context>
chip_gen: v6e
topology: v6e:2x2x1
jax: 0.10.0
libtpu: 0.0.40
codegen_flags: <defaults>
</compile_context>

<pallas_src>
import functools

import jax
import jax.numpy as jnp
from jax.experimental import pallas as pl
from jax.experimental.pallas import tpu as pltpu


# ----------------------------- kernel bodies --------------------------------

def _ln_compute(x, w, b, eps):
    xf = x.astype(jnp.float32)
    d = xf.shape[-1]
    inv_d = jnp.float32(1.0 / d)
    # One-pass stats: both reduces read the same loaded x (no mean->xc->var chain).
    s1 = jnp.sum(xf, axis=-1, keepdims=True)
    s2 = jnp.sum(xf * xf, axis=-1, keepdims=True)
    mean = s1 * inv_d
    # E[x^2] - mean^2 can round slightly negative -> clamp before rsqrt.
    var = jnp.maximum(s2 * inv_d - mean * mean, jnp.float32(0.0))
    inv = jax.lax.rsqrt(var + jnp.float32(eps))
    scale = inv * w.astype(jnp.float32)          # (TM,1)*(1,D) -> (TM,D)
    if b is None:
        y = (xf - mean) * scale
    else:
        # Fused epilogue: y = x*scale + (bias - mean*scale)
        y = xf * scale + (b.astype(jnp.float32) - mean * scale)
    return y


def _ln_kernel(x_ref, w_ref, o_ref, *, eps):
    o_ref[...] = _ln_compute(x_ref[...], w_ref[...], None, eps).astype(o_ref.dtype)


def _ln_bias_kernel(x_ref, w_ref, b_ref, o_ref, *, eps):
    o_ref[...] = _ln_compute(x_ref[...], w_ref[...], b_ref[...], eps).astype(o_ref.dtype)


# ----------------------------- tile selection -------------------------------

def _round_up(a, m):
    return ((a + m - 1) // m) * m


def _select_row_tile(n_rows, d, in_dtype, out_dtype, row_tile):
    in_sz = jnp.dtype(in_dtype).itemsize
    out_sz = jnp.dtype(out_dtype).itemsize
    # Packed-sublane multiple: f32 -> 8, bf16 -> 16, int8/fp8 -> 32.
    sub = max(8, 8 * (4 // in_sz), 8 * (4 // out_sz))

    # Generation-aware VMEM capacity (v5e/v6e 128 MiB, v7x 64 MiB per TC).
    try:
        vmem_cap = int(getattr(pltpu.get_tpu_info(), "vmem_capacity_bytes"))
    except Exception:  # fall back to the smallest (v7x per-TC) size
        vmem_cap = 64 * 1024 * 1024

    # Budget for double-buffered in + out tiles plus in-kernel f32 temps.
    vmem_budget = min(vmem_cap // 4, 32 * 1024 * 1024)
    bytes_per_row = d * (2 * in_sz + 2 * out_sz + 8)   # +8 B/elem f32-temp headroom
    max_rt = max(sub, (vmem_budget // bytes_per_row) // sub * sub)

    rt = max(sub, (min(row_tile, max_rt) // sub) * sub)
    rt = min(rt, _round_up(n_rows, sub))               # never bigger than the input

    # Keep each step >= ~1 MiB of input (amortizes ~0.35 us per-step overhead),
    # but give very large inputs enough grid steps for both v7x TensorCores.
    rt_floor = min(rt, _round_up(max(1, (1 << 20) // max(1, d * in_sz)), sub))
    target_steps = 8
    if n_rows > target_steps * rt_floor:
        rt = max(rt_floor, min(rt, _round_up(pl.cdiv(n_rows, target_steps), sub)))

    # Scoped-VMEM limit to pass to the compiler (v5e default is only 16 MiB).
    vmem_limit = int(min(vmem_cap // 2, max(2 * vmem_budget, 16 * 1024 * 1024)))
    return rt, vmem_limit


# ------------------------------- wrapper -------------------------------------

def layer_norm_pallas(x, weight=None, bias=None, *, eps=1e-5, row_tile=4096):
    """LayerNorm over the last dim of x (any leading dims).

    weight/bias: shape (D,) or None.  Matches F.layer_norm(x, (D,), weight, bias, eps).
    """
    orig_shape = x.shape
    D = orig_shape[-1]
    x_flat = x.reshape(-1, D)
    n_rows = x_flat.shape[0]

    if weight is None:
        weight = jnp.ones((D,), dtype=x.dtype)
    w2 = weight.reshape(1, D)

    rt, vmem_limit = _select_row_tile(n_rows, D, x.dtype, x.dtype, row_tile)
    grid = (pl.cdiv(n_rows, rt),)   # ragged last block handled by Pallas (OOB drop)

    if bias is not None:
        b2 = bias.reshape(1, D)
        kernel = functools.partial(_ln_bias_kernel, eps=eps)
        operands = (x_flat, w2, b2)
        in_specs = [
            pl.BlockSpec((rt, D), lambda i: (i, 0)),
            pl.BlockSpec((1, D), lambda i: (0, 0)),
            pl.BlockSpec((1, D), lambda i: (0, 0)),
        ]
    else:
        kernel = functools.partial(_ln_kernel, eps=eps)
        operands = (x_flat, w2)
        in_specs = [
            pl.BlockSpec((rt, D), lambda i: (i, 0)),
            pl.BlockSpec((1, D), lambda i: (0, 0)),
        ]

    out_flat = pl.pallas_call(
        kernel,
        out_shape=jax.ShapeDtypeStruct((n_rows, D), x.dtype),
        grid_spec=pltpu.PrefetchScalarGridSpec(
            num_scalar_prefetch=0,
            grid=grid,
            in_specs=in_specs,
            out_specs=pl.BlockSpec((rt, D), lambda i: (i, 0)),
        ),
        compiler_params=pltpu.CompilerParams(
            dimension_semantics=("parallel",),
            vmem_limit_bytes=vmem_limit,
        ),
    )(*operands)

    return out_flat.reshape(orig_shape)


# ------------------------------ reference / test -----------------------------

def _reference_layer_norm(x, weight, bias, eps=1e-5):
    xf = x.astype(jnp.float32)
    mean = jnp.mean(xf, axis=-1, keepdims=True)
    var = jnp.mean((xf - mean) ** 2, axis=-1, keepdims=True)
    y = (xf - mean) / jnp.sqrt(var + eps)
    if weight is not None:
        y = y * weight.astype(jnp.float32)
    if bias is not None:
        y = y + bias.astype(jnp.float32)
    return y.astype(x.dtype)


if __name__ == "__main__":
    key = jax.random.PRNGKey(0)
    kx, kw, kb, kx2 = jax.random.split(key, 4)

    # Module-consistent small shapes: x (batch, seq, hidden), LayerNorm over hidden.
    batch, seq, hidden = 2, 8, 128
    x = jax.random.normal(kx, (batch, seq, hidden), dtype=jnp.float32)
    # scale=True, bias=False (module defaults); non-trivial weight to exercise scale.
    weight = 1.0 + 0.1 * jax.random.normal(kw, (hidden,), dtype=jnp.float32)

    out = jax.block_until_ready(layer_norm_pallas(x, weight, None))
    ref = _reference_layer_norm(x, weight, None)
    assert out.shape == x.shape
    assert jnp.allclose(out, ref, atol=1e-5, rtol=1e-5)

    # Ragged row count (exercises the partial trailing block / OOB-drop path)
    # plus the optional-bias branch (scale=True, bias=True).
    x2 = jax.random.normal(kx2, (3, 7, hidden), dtype=jnp.float32)
    bias = 0.05 * jax.random.normal(kb, (hidden,), dtype=jnp.float32)
    out2 = jax.block_until_ready(layer_norm_pallas(x2, weight, bias))
    ref2 = _reference_layer_norm(x2, weight, bias)
    assert out2.shape == x2.shape
    assert jnp.allclose(out2, ref2, atol=1e-5, rtol=1e-5)

    print("KERNEL_OK")
</pallas_src>

<mosaic_0001>
module attributes {stable_mosaic.version = 11 : i64} {
  func.func @_ln_kernel(%arg0: i32, %arg1: memref<16x128xf32, #tpu.memory_space<vmem>>, %arg2: memref<1x128xf32, #tpu.memory_space<vmem>>, %arg3: memref<16x128xf32, #tpu.memory_space<vmem>>) attributes {dimension_semantics = [#tpu.dimension_semantics<parallel>], iteration_bounds = array<i64: 1>, scalar_prefetch = 0 : i64, scratch_operands = 0 : i64, tpu.core_type = #tpu.core_type<tc>, window_params = [{transform_indices = @transform_0, window_bounds = array<i64: 16, 128>}, {pipeline_mode = #tpu.pipeline_mode<synchronous>, transform_indices = @transform_1, window_bounds = array<i64: 1, 128>}, {transform_indices = @transform_2, window_bounds = array<i64: 16, 128>}]} {
    %c0 = arith.constant 0 : index
    %c0_0 = arith.constant 0 : index
    %0 = vector.load %arg1[%c0, %c0_0] : memref<16x128xf32, #tpu.memory_space<vmem>>, vector<16x128xf32>
    %c0_1 = arith.constant 0 : index
    %c0_2 = arith.constant 0 : index
    %1 = vector.load %arg2[%c0_1, %c0_2] : memref<1x128xf32, #tpu.memory_space<vmem>>, vector<1x128xf32>
    %cst = arith.constant dense<0.000000e+00> : vector<16xf32>
    %2 = vector.multi_reduction <add>, %0, %cst [1] : vector<16x128xf32> to vector<16xf32>
    %3 = vector.shape_cast %2 : vector<16xf32> to vector<16x1xf32>
    %4 = arith.mulf %0, %0 : vector<16x128xf32>
    %cst_3 = arith.constant dense<0.000000e+00> : vector<16xf32>
    %5 = vector.multi_reduction <add>, %4, %cst_3 [1] : vector<16x128xf32> to vector<16xf32>
    %6 = vector.shape_cast %5 : vector<16xf32> to vector<16x1xf32>
    %cst_4 = arith.constant 7.812500e-03 : f32
    %7 = vector.broadcast %cst_4 : f32 to vector<16x1xf32>
    %8 = arith.mulf %3, %7 : vector<16x1xf32>
    %cst_5 = arith.constant 7.812500e-03 : f32
    %9 = vector.broadcast %cst_5 : f32 to vector<16x1xf32>
    %10 = arith.mulf %6, %9 : vector<16x1xf32>
    %11 = arith.mulf %8, %8 : vector<16x1xf32>
    %12 = arith.subf %10, %11 : vector<16x1xf32>
    %cst_6 = arith.constant 0.000000e+00 : f32
    %13 = vector.broadcast %cst_6 : f32 to vector<16x1xf32>
    %14 = arith.maximumf %12, %13 : vector<16x1xf32>
    %cst_7 = arith.constant 9.99999974E-6 : f32
    %15 = vector.broadcast %cst_7 : f32 to vector<16x1xf32>
    %16 = arith.addf %14, %15 : vector<16x1xf32>
    %17 = math.rsqrt %16 : vector<16x1xf32>
    %18 = vector.broadcast %17 : vector<16x1xf32> to vector<16x128xf32>
    %19 = vector.broadcast %1 : vector<1x128xf32> to vector<16x128xf32>
    %20 = arith.mulf %18, %19 : vector<16x128xf32>
    %21 = vector.broadcast %8 : vector<16x1xf32> to vector<16x128xf32>
    %22 = arith.subf %0, %21 : vector<16x128xf32>
    %23 = arith.mulf %22, %20 : vector<16x128xf32>
    %c0_8 = arith.constant 0 : index
    %c0_9 = arith.constant 0 : index
    %24 = vector.load %arg3[%c0_8, %c0_9] : memref<16x128xf32, #tpu.memory_space<vmem>>, vector<16x128xf32>
    tpu.vector_store %arg3[%c0_8, %c0_9], %23 {strides = array<i32>} : memref<16x128xf32, #tpu.memory_space<vmem>>, vector<16x128xf32>,
    return
  }
  func.func @transform_0(%arg0: i32) -> (i32, i32) {
    %c0_i32 = arith.constant 0 : i32
    %c0_i32_0 = arith.constant 0 : i32
    return %arg0, %c0_i32 : i32, i32
  }
  func.func @transform_1(%arg0: i32) -> (i32, i32) {
    %c0_i32 = arith.constant 0 : i32
    %c0_i32_0 = arith.constant 0 : i32
    %c0_i32_1 = arith.constant 0 : i32
    return %c0_i32, %c0_i32_0 : i32, i32
  }
  func.func @transform_2(%arg0: i32) -> (i32, i32) {
    %c0_i32 = arith.constant 0 : i32
    %c0_i32_0 = arith.constant 0 : i32
    return %arg0, %c0_i32 : i32, i32
  }
}

</mosaic_0001>

<bundles_post_ra>
// kernel: tpu_custom_call.1
= control target key start
LH: loop header
LB: loop body
LE: loop exit
PB: predicated region body
PF: predicated region fallthrough
CT: control target
= control target key end

     0   :  { %7 = vsyncpa [#allocation3], 0  ;;  %s171_s0 = inlined_call_operand.hbm [shape: f32[16,128], index: 0, kind: input, shape index: {}]   ;;  %s172_s1 = inlined_call_operand.vmem [shape: f32[1,128], index: 1, kind: input, shape index: {}]   ;;  %s173_s2 = inlined_call_operand.hbm [shape: f32[16,128], index: 2, kind: output, shape index: {}]  }
   0x1   :  { %8 = vsyncpa [#allocation4], 0  ;;  %s137_s9 = smov [#allocation2]  }
   0x2   :  { %s14_s10 = sshll.u32 %s137_s9, 4  ;;  %s15_s10 = int_to_ptr.vmem [resolvable:$true] %s14_s10 }
   0x3   :  { %s101_s11 = scalar_lea.vmem %s15_s10, 256  ;;  %p106_p1 = scmp.lt.s32.totalorder %s15_s10, %s15_s10 }
   0x4   :  { %p102_p0 = scmp.ne.s32.totalorder %s15_s10, %s101_s11  ;;  %p107_p2 = scmp.lt.s32.totalorder %s101_s11, %s101_s11 }
   0x6   :  { %p108_p3 = por %p107_p2, %p106_p1 }
   0x8   :  { %p109_p4 = pnand %p108_p3, %p102_p0 }
   0xa   :  { %112 = shalt.err (!%p109_p4)
}
   0xb   :  { %s138_s12 = smov 128   ;;  %s139_s13 = smov 8  }
   0xc   :  { %20 = dma.hbm_to_vmem [thread:$0]  %s171_s0, 256, %s15_s10, [#allocation3], %s138_s12, %s138_s12, %s139_s13  }
   0xd   :  { %133 = dma.done.wait [#allocation3], 256  }
   0xe   :  { %134 = vsyncadd [#allocation3], 4294967040  ;;  %v26_v0 = vld [vmem:[#allocation2] sm:$0xff]  ;;  %v27_v1 = vld [vmem:[#allocation2 + $0x8] sm:$0xff]  ;;  %s140_s17 = smov [#allocation5]  }
   0xf   :  { %29 = vadd.xlane.f32.xlu0 %v26_v0  ;;  %v33_v2 = vmul.f32 %v26_v0, %v26_v0  ;;  %v34_v3 = vmul.f32 %v27_v1, %v27_v1  ;;  %v84_v20 = vld [vmem:[%s172_s1] ss:$0 sm:$0xff]  ;;  %s72_s18 = sshll.u32 %s140_s17, 4  ;;  %s73_s18 = int_to_ptr.vmem [resolvable:$true] %s72_s18 }
  0x10   :  { %s113_s19 = scalar_lea.vmem %s73_s18, 256  ;;  %p118_p6 = scmp.lt.s32.totalorder %s73_s18, %s73_s18 }
  0x11   :  { %35 = vadd.xlane.f32.xlu1 %v33_v2  ;;  %p114_p5 = scmp.ne.s32.totalorder %s73_s18, %s113_s19  ;;  %p119_p7 = scmp.lt.s32.totalorder %s113_s19, %s113_s19 }
  0x13   :  { %31 = vadd.xlane.f32.xlu0 %v27_v1  ;;  %p120_p8 = por %p119_p7, %p118_p6 }
  0x15   :  { %37 = vadd.xlane.f32.xlu1 %v34_v3  ;;  %p121_p9 = pnand %p120_p8, %p114_p5 }
  0x98   :  { %v30_v4 = vpop.xlane.xlu0 %29 }
  0x99   :  { %v39_v5 = vmul.f32 0.0078125, %v30_v4 }
  0x9a   :  { %v36_v6 = vpop.xlane.xlu1 %35 }
  0x9b   :  { %v43_v7 = vmul.f32 %v39_v5, %v39_v5  ;;  %v41_v8 = vmul.f32 0.0078125, %v36_v6  ;;  %v61_v22 = vsub.f32 %v26_v0, %v39_v5 }
  0x9c   :  { %v32_v9 = vpop.xlane.xlu0 %31 }
  0x9d   :  { %v45_v10 = vsub.f32 %v41_v8, %v43_v7  ;;  %v40_v11 = vmul.f32 0.0078125, %v32_v9 }
  0x9e   :  { %v38_v12 = vpop.xlane.xlu1 %37 }
  0x9f   :  { %v47_v13 = vmax.f32 %v45_v10, 0.0  ;;  %v44_v14 = vmul.f32 %v40_v11, %v40_v11  ;;  %v42_v15 = vmul.f32 0.0078125, %v38_v12  ;;  %v62_v26 = vsub.f32 %v27_v1, %v40_v11 }
  0xa1   :  { %v49_v16 = vadd.f32 1e-05, %v47_v13  ;;  %v46_v17 = vsub.f32 %v42_v15, %v44_v14 }
  0xa3   :  { %89 = vrsqrt.f32 %v49_v16  ;;  %v48_v18 = vmax.f32 %v46_v17, 0.0 }
  0xa5   :  { %v50_v19 = vadd.f32 1e-05, %v48_v18 }
  0xa7   :  { %91 = vrsqrt.f32 %v50_v19 }
  0xb0   :  { %v90_v21 = vpop.eup %89 }
  0xb1   :  { %v59_v23 = vmul.f32 %v90_v21, %v84_v20 }
  0xb3   :  { %v63_v24 = vmul.f32 %v61_v22, %v59_v23 }
  0xb4   :  { %v92_v25 = vpop.eup %91 }
  0xb5   :  { %v60_v27 = vmul.f32 %v92_v25, %v84_v20  ;;  %65 = vst [vmem:[#allocation5] sm:$0xff] %v63_v24 }
  0xb7   :  { %v64_v28 = vmul.f32 %v62_v26, %v60_v27 }
  0xb9   :  { %66 = vst [vmem:[#allocation5 + $0x8] sm:$0xff] %v64_v28 }
  0xba   :  { %124 = shalt.err (!%p121_p9)
}
  0xbb   :  { %78 = dma.vmem_to_hbm [thread:$0]  %s73_s18, 256, %s173_s2, [#allocation4], %s138_s12, %s138_s12, %s139_s13  }
  0xbc   :  { %135 = dma.done.wait [#allocation4], 256  }
  0xbd   :  { %136 = vsyncadd [#allocation4], 4294967040 }
  0xbe   :  { %82 = vsyncpa [#allocation3], 1 }
  0xbf   :  { %83 = vsyncpa [#allocation4], 1 }

</bundles_post_ra>
